<compile_context>
chip_gen: v5e
topology: v5e:2x2
jax: 0.10.0
libtpu: 0.0.40
codegen_flags: <defaults>
</compile_context>

<pallas_src>
import jax
import jax.numpy as jnp
from jax import lax
from jax.experimental import pallas as pl
from jax.experimental.pallas import tpu as pltpu


# --------------------------------------------------------------------------- #
# Kernel
# --------------------------------------------------------------------------- #
def _gelu_exact(x):
    # torch.nn.GELU() default is the exact erf formulation.
    return 0.5 * x * (1.0 + lax.erf(x * 0.7071067811865476))


def mlp_kernel(x_ref, w1_ref, b1_ref, w2_ref, b2_ref, o_ref, acc_ref):
    # x_ref:  (TM, H)  (input dtype)   w1_ref: (H, TN) bf16   b1_ref: (1, TN) f32
    # w2_ref: (TN, H)  bf16            b2_ref: (1, H)  f32
    # o_ref:  (TM, H)                  acc_ref: (TM, H) f32 scratch (lives across n)
    n = pl.program_id(1)

    @pl.when(n == 0)
    def _():
        # Fold the fc2 bias into the accumulator init (one broadcast per row-tile).
        acc_ref[...] = jnp.broadcast_to(b2_ref[...], acc_ref.shape)

    # fc1 slice on the MXU (bf16 operands, f32 accumulation).  The x tile is
    # resident across the n axis; the per-step cast is VPU filler hidden under
    # the MXU.
    x_bf = x_ref[...].astype(jnp.bfloat16)
    h = jnp.dot(x_bf, w1_ref[...], preferred_element_type=jnp.float32)
    # Bias must be added per-TN-tile *before* GELU (GELU is nonlinear).
    h = _gelu_exact(h + b1_ref[...])

    # fc2 partial product: accumulate over the 4H reduction axis.
    acc_ref[...] += jnp.dot(h.astype(w2_ref.dtype), w2_ref[...],
                            preferred_element_type=jnp.float32)

    @pl.when(n == pl.num_programs(1) - 1)
    def _():
        o_ref[...] = acc_ref[...].astype(o_ref.dtype)


# --------------------------------------------------------------------------- #
# Per-generation tiling
# --------------------------------------------------------------------------- #
def _round_up(x, m):
    return ((x + m - 1) // m) * m


def _cdiv(a, b):
    return -(-a // b)


def _tpu_info():
    """(vmem_capacity_bytes, tensorcores_per_chip) with conservative fallbacks."""
    cap, cores = 64 * 2**20, 1            # v7x-safe defaults (64 MiB / assume 1 TC)
    try:
        info = pltpu.get_tpu_info()
        cap = int(getattr(info, "vmem_capacity_bytes", cap) or cap)
        for name in ("num_tensorcores", "tensorcores_per_chip",
                     "num_cores_per_chip", "num_cores", "core_count"):
            v = getattr(info, name, None)
            if v:
                cores = int(v)
                break
    except Exception:
        pass
    return cap, cores


def _select_tiles(M, H, H4, x_itemsize, out_itemsize, vmem_cap, cores):
    """VMEM-budgeted (TM, TN) selection.

    Budget ~= 75% of physical VMEM (leaves headroom for compiler temporaries /
    semaphores): ~48 MiB on v7x, ~96 MiB on v5e/v6e.  TM is kept as large as
    possible (it sets weight reuse and per-step arithmetic intensity); TN is
    traded down first when VMEM is tight.
    """
    budget = int(0.75 * vmem_cap)

    def footprint(tm, tn):
        return (2 * tm * H * x_itemsize        # x tiles (double-buffered)
                + 2 * H * tn * 2               # w1 bf16 tiles
                + 2 * tn * H * 2               # w2 bf16 tiles
                + 2 * (tn + H) * 4             # bias tiles
                + 2 * tm * H * out_itemsize    # out tiles
                + tm * H * 4                   # f32 accumulator scratch
                + tm * tn * 8)                 # h (f32) + bf16 copy temporaries

    # Row-tile candidates.
    if M <= 128:
        tm_cands = [_round_up(M, 8)]           # single full-height row block
    else:
        tm_cands = [t for t in (1024, 768, 512, 384, 256, 128)
                    if t <= _round_up(M, 128)] or [128]
        # On multi-TensorCore chips keep >= 2 row blocks (when M allows) so the
        # "parallel" axis can actually be sharded across cores.
        if cores >= 2 and M >= 512:
            multi = [t for t in tm_cands if _cdiv(M, t) >= 2]
            if multi:
                tm_cands = multi

    # Reduction-tile candidates (lane-aligned).
    tn_cap = _round_up(H4, 128)
    tn_cands = [t for t in (2048, 1024, 512, 256, 128) if t <= tn_cap] or [tn_cap]

    viable = []
    for tm in tm_cands:
        fits = [tn for tn in tn_cands if footprint(tm, tn) <= budget]
        if fits:
            # Prefer a TN that divides H4 exactly (avoids padding the weights).
            div = [tn for tn in fits if H4 % tn == 0]
            viable.append((tm, (div or fits)[0]))

    if not viable:                              # pathological H: smallest tiles
        tm, tn = tm_cands[-1], tn_cands[-1]
        return tm, tn, footprint(tm, tn)

    # Among viable TMs: minimize weight re-streaming (row-block count), then
    # row-padding waste, then prefer the larger tile.
    tm, tn = min(viable,
                 key=lambda p: (_cdiv(M, p[0]), _cdiv(M, p[0]) * p[0], -p[0]))
    return tm, tn, footprint(tm, tn)


# --------------------------------------------------------------------------- #
# Forward wrapper
# --------------------------------------------------------------------------- #
def mlp_forward(x, w1, b1, w2, b2):
    """x: [..., H] -> [..., H], matching torch MLP.forward semantics.

    Weights are expected in kernel layout/dtype (see prepare_params):
      w1: [H, 4H] bf16, b1: [1, 4H] f32, w2: [4H, H] bf16, b2: [1, H] f32.
    """
    orig_shape = x.shape
    H = orig_shape[-1]
    x2d = x.reshape(-1, H)
    M = x2d.shape[0]
    H4 = w1.shape[1]
    out_dtype = x.dtype
    out_itemsize = jnp.dtype(out_dtype).itemsize

    # No-op when params were prepared once (the expected path); only falls
    # back to an in-graph cast if the caller passed raw f32 weights.
    if w1.dtype != jnp.bfloat16:
        w1 = w1.astype(jnp.bfloat16)
    if w2.dtype != jnp.bfloat16:
        w2 = w2.astype(jnp.bfloat16)
    b1 = b1.astype(jnp.float32).reshape(1, -1)
    b2 = b2.astype(jnp.float32).reshape(1, -1)

    vmem_cap, cores = _tpu_info()
    TM, TN, footprint = _select_tiles(M, H, H4, x2d.dtype.itemsize,
                                      out_itemsize, vmem_cap, cores)

    grid_m, grid_n = _cdiv(M, TM), _cdiv(H4, TN)
    M_pad, H4_pad = grid_m * TM, grid_n * TN

    # Zero-pad ragged dims up to the tile grid.  Padding the 4H axis with
    # zeros is exact: gelu(0 + 0) = 0 contributes nothing to fc2.
    if M_pad != M:
        x2d = jnp.pad(x2d, ((0, M_pad - M), (0, 0)))
    if H4_pad != H4:
        w1 = jnp.pad(w1, ((0, 0), (0, H4_pad - H4)))
        b1 = jnp.pad(b1, ((0, 0), (0, H4_pad - H4)))
        w2 = jnp.pad(w2, ((0, H4_pad - H4), (0, 0)))

    # Honest HBM-traffic estimate: x read once, weights streamed once per
    # row-block, output written once.
    w_bytes = (w1.size + w2.size) * 2 + (b1.size + b2.size) * 4
    bytes_accessed = int(x2d.size * x2d.dtype.itemsize
                         + grid_m * w_bytes
                         + M_pad * H * out_itemsize)
    flops = 4 * M_pad * H * H4_pad          # two matmuls, 2*M*H*H4 each
    transcendentals = M_pad * H4_pad        # one erf per intermediate element

    # Scoped-VMEM limit: enough for the chosen tiles plus headroom, never more
    # than ~the physical capacity (so v6e/v5e can use >64 MiB, v7x stays safe).
    vmem_limit = int(min(vmem_cap, max(32 * 2**20, footprint + (8 << 20))))

    out = pl.pallas_call(
        mlp_kernel,
        out_shape=jax.ShapeDtypeStruct((M_pad, H), out_dtype),
        grid_spec=pltpu.PrefetchScalarGridSpec(
            num_scalar_prefetch=0,
            grid=(grid_m, grid_n),
            in_specs=[
                pl.BlockSpec((TM, H), lambda i, n: (i, 0)),   # x row-tile (resident over n)
                pl.BlockSpec((H, TN), lambda i, n: (0, n)),   # w1 column-tile
                pl.BlockSpec((1, TN), lambda i, n: (0, n)),   # b1 tile
                pl.BlockSpec((TN, H), lambda i, n: (n, 0)),   # w2 row-tile
                pl.BlockSpec((1, H), lambda i, n: (0, 0)),    # b2 (resident)
            ],
            out_specs=pl.BlockSpec((TM, H), lambda i, n: (i, 0)),
            scratch_shapes=[pltpu.VMEM((TM, H), jnp.float32)],
        ),
        compiler_params=pltpu.CompilerParams(
            dimension_semantics=("parallel", "arbitrary"),
            vmem_limit_bytes=vmem_limit,
        ),
        cost_estimate=pl.CostEstimate(
            flops=flops,
            transcendentals=transcendentals,
            bytes_accessed=bytes_accessed,
        ),
    )(x2d, w1, b1, w2, b2)

    return out[:M].reshape(orig_shape)


# --------------------------------------------------------------------------- #
# Parameter helpers
# --------------------------------------------------------------------------- #
def init_params(key, hidden_size, dtype=jnp.float32):
    """Deterministic init mimicking nn.Linear default (uniform +/- 1/sqrt(fan_in)).

    Weights stored as [in, out] (transposed vs. torch's [out, in]); biases 1-D.
    """
    k1, k2, k3, k4 = jax.random.split(key, 4)
    h, h4 = hidden_size, hidden_size * 4
    bound1 = 1.0 / jnp.sqrt(h)
    bound2 = 1.0 / jnp.sqrt(h4)
    w1 = jax.random.uniform(k1, (h, h4), dtype, -bound1, bound1)
    b1 = jax.random.uniform(k2, (h4,), dtype, -bound1, bound1)
    w2 = jax.random.uniform(k3, (h4, h), dtype, -bound2, bound2)
    b2 = jax.random.uniform(k4, (h,), dtype, -bound2, bound2)
    return w1, b1, w2, b2


def prepare_params(w1, b1, w2, b2):
    """One-time conversion to kernel layout/dtypes.

    Call ONCE (e.g. after init / checkpoint load) and keep the result; the
    forward pass then moves no extra weight bytes per call.
    """
    return (jnp.asarray(w1, jnp.bfloat16),
            jnp.asarray(b1, jnp.float32).reshape(1, -1),
            jnp.asarray(w2, jnp.bfloat16),
            jnp.asarray(b2, jnp.float32).reshape(1, -1))


# --------------------------------------------------------------------------- #
if __name__ == "__main__":
    hidden_size = 32
    batch, seq = 2, 8

    key = jax.random.PRNGKey(0)
    kx, kp = jax.random.split(key)
    x = jax.random.normal(kx, (batch, seq, hidden_size), jnp.float32)

    # f32 "torch-like" params for the reference; bf16 kernel params made once.
    w1, b1, w2, b2 = init_params(kp, hidden_size)
    kw1, kb1, kw2, kb2 = prepare_params(w1, b1, w2, b2)

    fwd = jax.jit(mlp_forward)
    out = fwd(x, kw1, kb1, kw2, kb2)
    jax.block_until_ready(out)

    # Sanity check against plain-JAX reference (f32; kernel uses bf16 MXU
    # operands with f32 accumulation, so use a bf16-appropriate tolerance).
    ref = jax.nn.gelu(x @ w1 + b1, approximate=False) @ w2 + b2
    assert out.shape == (batch, seq, hidden_size)
    assert jnp.allclose(out, ref, atol=3e-2, rtol=3e-2), float(
        jnp.max(jnp.abs(out - ref)))

    print("KERNEL_OK")
</pallas_src>

<mosaic_0001>
module attributes {stable_mosaic.version = 11 : i64} {
  func.func @mlp_kernel(%arg0: i32, %arg1: i32, %arg2: memref<16x32xf32, #tpu.memory_space<vmem>>, %arg3: memref<32x128xbf16, #tpu.memory_space<vmem>>, %arg4: memref<1x128xf32, #tpu.memory_space<vmem>>, %arg5: memref<128x32xbf16, #tpu.memory_space<vmem>>, %arg6: memref<1x32xf32, #tpu.memory_space<vmem>>, %arg7: memref<16x32xf32, #tpu.memory_space<vmem>>, %arg8: memref<16x32xf32, #tpu.memory_space<vmem>>) attributes {dimension_semantics = [#tpu.dimension_semantics<parallel>, #tpu.dimension_semantics<arbitrary>], iteration_bounds = array<i64: 1, 1>, scalar_prefetch = 0 : i64, scratch_operands = 1 : i64, tpu.core_type = #tpu.core_type<tc>, window_params = [{transform_indices = @transform_0, window_bounds = array<i64: 16, 32>}, {transform_indices = @transform_1, window_bounds = array<i64: 32, 128>}, {transform_indices = @transform_2, window_bounds = array<i64: 1, 128>}, {transform_indices = @transform_3, window_bounds = array<i64: 128, 32>}, {pipeline_mode = #tpu.pipeline_mode<synchronous>, transform_indices = @transform_4, window_bounds = array<i64: 1, 32>}, {transform_indices = @transform_5, window_bounds = array<i64: 16, 32>}]} {
    %c0_i32 = arith.constant 0 : i32
    %0 = arith.cmpi eq, %arg1, %c0_i32 : i32
    %1 = arith.extui %0 : i1 to i32
    %c0_i32_0 = arith.constant 0 : i32
    %2 = arith.cmpi ne, %1, %c0_i32_0 : i32
    scf.if %2 {
      %c0_18 = arith.constant 0 : index
      %c0_19 = arith.constant 0 : index
      %27 = vector.load %arg6[%c0_18, %c0_19] : memref<1x32xf32, #tpu.memory_space<vmem>>, vector<1x32xf32>
      %28 = vector.shape_cast %27 : vector<1x32xf32> to vector<1x32xf32>
      %29 = vector.broadcast %28 : vector<1x32xf32> to vector<16x32xf32>
      %c0_20 = arith.constant 0 : index
      %c0_21 = arith.constant 0 : index
      %30 = vector.load %arg8[%c0_20, %c0_21] : memref<16x32xf32, #tpu.memory_space<vmem>>, vector<16x32xf32>
      tpu.vector_store %arg8[%c0_20, %c0_21], %29 {strides = array<i32>} : memref<16x32xf32, #tpu.memory_space<vmem>>, vector<16x32xf32>,
    } else {
    }
    %c0 = arith.constant 0 : index
    %c0_1 = arith.constant 0 : index
    %3 = vector.load %arg2[%c0, %c0_1] : memref<16x32xf32, #tpu.memory_space<vmem>>, vector<16x32xf32>
    %4 = arith.truncf %3 : vector<16x32xf32> to vector<16x32xbf16>
    %c0_2 = arith.constant 0 : index
    %c0_3 = arith.constant 0 : index
    %5 = vector.load %arg3[%c0_2, %c0_3] : memref<32x128xbf16, #tpu.memory_space<vmem>>, vector<32x128xbf16>
    %cst = arith.constant dense<0.000000e+00> : vector<16x128xf32>
    %6 = tpu.matmul %4, %5, %cst {dimension_numbers = #tpu.dot_dimension_numbers<[1], [0], [0], [1], [0, 0, 1, 1], [], []>} : vector<16x32xbf16>, vector<32x128xbf16>, vector<16x128xf32> -> vector<16x128xf32>
    %c0_4 = arith.constant 0 : index
    %c0_5 = arith.constant 0 : index
    %7 = vector.load %arg4[%c0_4, %c0_5] : memref<1x128xf32, #tpu.memory_space<vmem>>, vector<1x128xf32>
    %8 = vector.broadcast %7 : vector<1x128xf32> to vector<16x128xf32>
    %9 = arith.addf %6, %8 : vector<16x128xf32>
    %cst_6 = arith.constant 5.000000e-01 : f32
    %10 = vector.broadcast %cst_6 : f32 to vector<16x128xf32>
    %11 = arith.mulf %10, %9 : vector<16x128xf32>
    %cst_7 = arith.constant 0.707106769 : f32
    %12 = vector.broadcast %cst_7 : f32 to vector<16x128xf32>
    %13 = arith.mulf %9, %12 : vector<16x128xf32>
    %14 = math.erf %13 : vector<16x128xf32>
    %cst_8 = arith.constant 1.000000e+00 : f32
    %15 = vector.broadcast %cst_8 : f32 to vector<16x128xf32>
    %16 = arith.addf %15, %14 : vector<16x128xf32>
    %17 = arith.mulf %11, %16 : vector<16x128xf32>
    %c0_9 = arith.constant 0 : index
    %c0_10 = arith.constant 0 : index
    %18 = vector.load %arg8[%c0_9, %c0_10] : memref<16x32xf32, #tpu.memory_space<vmem>>, vector<16x32xf32>
    %19 = arith.truncf %17 : vector<16x128xf32> to vector<16x128xbf16>
    %c0_11 = arith.constant 0 : index
    %c0_12 = arith.constant 0 : index
    %20 = vector.load %arg5[%c0_11, %c0_12] : memref<128x32xbf16, #tpu.memory_space<vmem>>, vector<128x32xbf16>
    %cst_13 = arith.constant dense<0.000000e+00> : vector<16x32xf32>
    %21 = tpu.matmul %19, %20, %cst_13 {dimension_numbers = #tpu.dot_dimension_numbers<[1], [0], [0], [1], [0, 0, 1, 1], [], []>} : vector<16x128xbf16>, vector<128x32xbf16>, vector<16x32xf32> -> vector<16x32xf32>
    %22 = arith.addf %18, %21 : vector<16x32xf32>
    %c0_14 = arith.constant 0 : index
    %c0_15 = arith.constant 0 : index
    %23 = vector.load %arg8[%c0_14, %c0_15] : memref<16x32xf32, #tpu.memory_space<vmem>>, vector<16x32xf32>
    tpu.vector_store %arg8[%c0_14, %c0_15], %22 {strides = array<i32>} : memref<16x32xf32, #tpu.memory_space<vmem>>, vector<16x32xf32>,
    %c0_i32_16 = arith.constant 0 : i32
    %24 = arith.cmpi eq, %arg1, %c0_i32_16 : i32
    %25 = arith.extui %24 : i1 to i32
    %c0_i32_17 = arith.constant 0 : i32
    %26 = arith.cmpi ne, %25, %c0_i32_17 : i32
    scf.if %26 {
      %c0_18 = arith.constant 0 : index
      %c0_19 = arith.constant 0 : index
      %27 = vector.load %arg8[%c0_18, %c0_19] : memref<16x32xf32, #tpu.memory_space<vmem>>, vector<16x32xf32>
      %c0_20 = arith.constant 0 : index
      %c0_21 = arith.constant 0 : index
      %28 = vector.load %arg7[%c0_20, %c0_21] : memref<16x32xf32, #tpu.memory_space<vmem>>, vector<16x32xf32>
      tpu.vector_store %arg7[%c0_20, %c0_21], %27 {strides = array<i32>} : memref<16x32xf32, #tpu.memory_space<vmem>>, vector<16x32xf32>,
    } else {
    }
    return
  }
  func.func @transform_0(%arg0: i32, %arg1: i32) -> (i32, i32) {
    %c0_i32 = arith.constant 0 : i32
    %c0_i32_0 = arith.constant 0 : i32
    return %arg0, %c0_i32 : i32, i32
  }
  func.func @transform_1(%arg0: i32, %arg1: i32) -> (i32, i32) {
    %c0_i32 = arith.constant 0 : i32
    %c0_i32_0 = arith.constant 0 : i32
    return %c0_i32, %arg1 : i32, i32
  }
  func.func @transform_2(%arg0: i32, %arg1: i32) -> (i32, i32) {
    %c0_i32 = arith.constant 0 : i32
    %c0_i32_0 = arith.constant 0 : i32
    return %c0_i32, %arg1 : i32, i32
  }
  func.func @transform_3(%arg0: i32, %arg1: i32) -> (i32, i32) {
    %c0_i32 = arith.constant 0 : i32
    %c0_i32_0 = arith.constant 0 : i32
    return %arg1, %c0_i32 : i32, i32
  }
  func.func @transform_4(%arg0: i32, %arg1: i32) -> (i32, i32) {
    %c0_i32 = arith.constant 0 : i32
    %c0_i32_0 = arith.constant 0 : i32
    %c0_i32_1 = arith.constant 0 : i32
    return %c0_i32, %c0_i32_0 : i32, i32
  }
  func.func @transform_5(%arg0: i32, %arg1: i32) -> (i32, i32) {
    %c0_i32 = arith.constant 0 : i32
    %c0_i32_0 = arith.constant 0 : i32
    return %arg0, %c0_i32 : i32, i32
  }
}

</mosaic_0001>

<bundles_post_ra>
// kernel: mlp_forward.1
= control target key start
LH: loop header
LB: loop body
LE: loop exit
PB: predicated region body
PF: predicated region fallthrough
CT: control target
= control target key end

     0   :  { %s463_s0 = inlined_call_operand.vmem [shape: f32[16,32], index: 0, kind: input, shape index: {}]   ;;  %s464_s1 = inlined_call_operand.vmem [shape: bf16[32,128], index: 1, kind: input, shape index: {}]   ;;  %s465_s2 = inlined_call_operand.vmem [shape: f32[1,128], index: 2, kind: input, shape index: {}]   ;;  %s466_s3 = inlined_call_operand.vmem [shape: bf16[128,32], index: 3, kind: input, shape index: {}]   ;;  %s467_s4 = inlined_call_operand.vmem [shape: f32[1,32], index: 4, kind: input, shape index: {}]   ;;  %s468_s5 = inlined_call_operand.hbm [shape: f32[16,32], index: 5, kind: output, shape index: {}]  }
   0x1   :  { %v316_v0 = vld [vmem:[%s464_s1 + $0x8] sm:$0xff]  ;;  %v315_v1 = vld [vmem:[%s464_s1] sm:$0xff] }
   0x2   :  { %v33_v2 = vld [vmem:[%s463_s0] sm:$0xff]  ;;  %66 = vmatpush.bf16.msra.mxu0 %v316_v0  ;;  %v34_v3 = vld [vmem:[%s463_s0 + $0x8] sm:$0xff] }
   0x3   :  { %10 = vsyncpa [#allocation4], 0  ;;  %v35_v4 = vpack.c.bf16 %v34_v3, %v33_v2  ;;  %vm30_vm0 = vcmask 261120   ;;  %v328_v5 = vld [vmem:[%s465_s2] ss:$0 sm:$0xff]  ;;  %v324_v6 = vld [vmem:[%s466_s3 + $0x38] sm:$0xff] }
   0x4   :  { %229 = vmatpush.bf16.msra.mxu1 %v324_v6  ;;  %v323_v10 = vld [vmem:[%s466_s3 + $0x30] sm:$0xff]  ;;  %v322_v12 = vld [vmem:[%s466_s3 + $0x28] sm:$0xff]  ;;  %v321_v17 = vld [vmem:[%s466_s3 + $0x20] sm:$0xff]  ;;  %s260_s20 = sshll.u32 %s468_s5, 4  ;;  %s361_s21 = smov 128   ;;  %s261_s20 = int_to_ptr.hbm [resolvable:$true] %s260_s20 }
   0x5   :  { %v320_v23 = vld [vmem:[%s466_s3 + $0x18] sm:$0xff]  ;;  %v319_v29 = vld [vmem:[%s466_s3 + $0x10] sm:$0xff]  ;;  %v318_v37 = vld [vmem:[%s466_s3 + $0x8] sm:$0xff]  ;;  %s362_s22 = smov 8  }
   0x6   :  { %67 = vmatpush.bf16.msra.mxu0 %v315_v1  ;;  %v317_v44 = vld [vmem:[%s466_s3] sm:$0xff]  ;;  %s360_s3 = smov [#allocation3]  }
   0x7   :  { %v329_v55 = vld [vmem:[%s467_s4] ss:$0 sm:$0xff]  ;;  %s258_s4 = sshll.u32 %s360_s3, 4  ;;  %s259_s4 = int_to_ptr.vmem [resolvable:$true] %s258_s4 }
   0x8   :  { %230 = vmatpush.bf16.msra.mxu1 %v323_v10  ;;  %31 = vst.msk [vmem:[#allocation2] sm:$0xff] %vm30_vm0, %v329_v55 }
   0x9   :  { %280 = vmatmul.msk.bf16.vlgmr.msra.gmra.mxu0 %vm30_vm0, %v35_v4  ;;  %32 = vst.msk [vmem:[#allocation2 + $0x8] sm:$0xff] %vm30_vm0, %v329_v55 }
   0xc   :  { %231 = vmatpush.bf16.msra.mxu1 %v322_v12 }
  0x10   :  { %232 = vmatpush.bf16.msra.mxu1 %v321_v17 }
  0x14   :  { %233 = vmatpush.bf16.msra.mxu1 %v320_v23 }
  0x18   :  { %234 = vmatpush.bf16.msra.mxu1 %v319_v29 }
  0x1c   :  { %235 = vmatpush.bf16.msra.mxu1 %v318_v37  ;;  %v162_v37 = vld [vmem:[#allocation2] sm:$0xff] }
  0x20   :  { %236 = vmatpush.bf16.msra.mxu1 %v317_v44 }
  0x86   :  { %v69_v7 = vpop.f32.mrf.mxu0 }
  0x87   :  { %v412_v8 = vadd.f32 %v328_v5, %v69_v7 }
  0x89   :  { %v415_v9 = vmul.f32 0.70710677, %v412_v8 }
  0x8b   :  { %v78_v11 = vmul.f32 %v415_v9, %v415_v9 }
  0x8d   :  { %v79_v13 = vmin.f32 %v78_v11, 16.0 }
  0x8e   :  { %v71_v14 = vpop.f32.mrf.mxu0 }
  0x8f   :  { %v80_v15 = vmul.f32 2.1237322e-06, %v79_v13  ;;  %v425_v16 = vadd.f32 %v328_v5, %v71_v14  ;;  %v91_v18 = vmul.f32 3.8918573e-05, %v79_v13 }
  0x91   :  { %v81_v19 = vadd.f32 0.00028619796, %v80_v15  ;;  %v431_v20 = vmul.f32 0.70710677, %v425_v16  ;;  %v92_v21 = vadd.f32 0.001143296, %v91_v18 }
  0x93   :  { %v118_v22 = vmul.f32 %v431_v20, %v431_v20  ;;  %v82_v24 = vmul.f32 %v81_v19, %v79_v13  ;;  %v93_v25 = vmul.f32 %v92_v21, %v79_v13 }
  0x95   :  { %v119_v26 = vmin.f32 %v118_v22, 16.0  ;;  %v94_v27 = vadd.f32 0.014752088, %v93_v25  ;;  %v83_v31 = vadd.f32 0.0036580483, %v82_v24 }
  0x97   :  { %v120_v28 = vmul.f32 2.1237322e-06, %v119_v26  ;;  %v131_v30 = vmul.f32 3.8918573e-05, %v119_v26  ;;  %v95_v32 = vmul.f32 %v94_v27, %v79_v13  ;;  %v84_v39 = vmul.f32 %v83_v31, %v79_v13 }
  0x98   :  { %v74_v31 = vmul.f32 0.5, %v412_v8 }
  0x99   :  { %v121_v33 = vadd.f32 0.00028619796, %v120_v28  ;;  %v132_v34 = vadd.f32 0.001143296, %v131_v30  ;;  %v96_v35 = vadd.f32 0.112945676, %v95_v32 }
  0x9a   :  { %v85_v46 = vadd.f32 0.05243302, %v84_v39  ;;  %v75_v32 = vmul.f32 0.5, %v425_v16 }
  0x9b   :  { %v122_v36 = vmul.f32 %v121_v33, %v119_v26  ;;  %v133_v38 = vmul.f32 %v132_v34, %v119_v26  ;;  %v97_v40 = vmul.f32 %v96_v35, %v79_v13 }
  0x9c   :  { %v86_v52 = vmul.f32 %v85_v46, %v79_v13 }
  0x9d   :  { %v123_v41 = vadd.f32 0.0036580483, %v122_v36  ;;  %v134_v42 = vadd.f32 0.014752088, %v133_v38  ;;  %v98_v43 = vadd.f32 0.4994258, %v97_v40 }
  0x9e   :  { %v87_v57 = vadd.f32 0.18741608, %v86_v52 }
  0x9f   :  { %v135_v45 = vmul.f32 %v134_v42, %v119_v26  ;;  %v99_v47 = vmul.f32 %v98_v43, %v79_v13  ;;  %v124_v48 = vmul.f32 %v123_v41, %v119_v26 }
  0xa0   :  { %v88_v62 = vmul.f32 %v87_v57, %v79_v13 }
  0xa1   :  { %v136_v49 = vadd.f32 0.112945676, %v135_v45  ;;  %v100_v50 = vadd.f32 1.0, %v99_v47  ;;  %v125_v53 = vadd.f32 0.05243302, %v124_v48 }
  0xa2   :  { %v89_v4 = vadd.f32 1.1283791, %v88_v62 }
  0xa3   :  { %v137_v51 = vmul.f32 %v136_v49, %v119_v26  ;;  %330 = vrcp.f32 %v100_v50  ;;  %v126_v58 = vmul.f32 %v125_v53, %v119_v26  ;;  %v112_v1 = vand.u32 2147483648, %v100_v50 }
  0xa4   :  { %v110_v3 = vand.u32 2147483647, %v100_v50  ;;  %vm106_vm2 = vweird.f32 %v100_v50  ;;  %v90_v14 = vmul.f32 %v89_v4, %v415_v9 }
  0xa5   :  { %v138_v54 = vadd.f32 0.4994258, %v137_v51  ;;  %v127_v63 = vadd.f32 0.18741608, %v126_v58  ;;  %v113_v10 = vor.u32 1.1754944e-38, %v112_v1 }
  0xa6   :  { %vm111_vm4 = vcmp.eq.f32.partialorder %v110_v3, 8.507059e+37 }
  0xa7   :  { %v139_v56 = vmul.f32 %v138_v54, %v119_v26  ;;  %v128_v6 = vmul.f32 %v127_v63, %v119_v26 }
  0xa9   :  { %v140_v59 = vadd.f32 1.0, %v139_v56  ;;  %v331_v60 = vpop.eup %330  ;;  %v129_v17 = vadd.f32 1.1283791, %v128_v6 }
  0xaa   :  { %v102_v61 = vmul.f32 %v331_v60, %v100_v50  ;;  %vm107_vm1 = vweird.f32 %v331_v60 }
  0xab   :  { %332 = vrcp.f32 %v140_v59  ;;  %vm108_vm3 = vmor %vm106_vm2, %vm107_vm1  ;;  %v152_v18 = vand.u32 2147483648, %v140_v59  ;;  %v150_v22 = vand.u32 2147483647, %v140_v59  ;;  %vm146_vm6 = vweird.f32 %v140_v59 }
  0xac   :  { %v103_v0 = vsub.f32 1.0, %v102_v61  ;;  %v130_v25 = vmul.f32 %v129_v17, %v431_v20  ;;  %v163_v20 = vld [vmem:[#allocation2 + $0x8] sm:$0xff] }
  0xad   :  { %v153_v24 = vor.u32 1.1754944e-38, %v152_v18  ;;  %vm151_vm8 = vcmp.eq.f32.partialorder %v150_v22, 8.507059e+37 }
  0xae   :  { %v104_v2 = vmul.f32 %v331_v60, %v103_v0 }
  0xb0   :  { %v105_v7 = vadd.f32 %v331_v60, %v104_v2 }
  0xb1   :  { %v333_v5 = vpop.eup %332 }
  0xb2   :  { %v142_v11 = vmul.f32 %v333_v5, %v140_v59  ;;  %v109_v12 = vsel %vm108_vm3, %v331_v60, %v105_v7  ;;  %vm147_vm5 = vweird.f32 %v333_v5 }
  0xb3   :  { %v114_v15 = vsel %vm111_vm4, %v113_v10, %v109_v12  ;;  %vm148_vm7 = vmor %vm146_vm6, %vm147_vm5 }
  0xb4   :  { %v143_v13 = vsub.f32 1.0, %v142_v11  ;;  %v115_v19 = vmul.f32 %v114_v15, %v90_v14 }
  0xb6   :  { %v144_v21 = vmul.f32 %v333_v5, %v143_v13  ;;  %v281_v26 = vclamps-f32 %v115_v19, 1.0 }
  0xb8   :  { %v145_v23 = vadd.f32 %v333_v5, %v144_v21  ;;  %v158_v30 = vadd.f32 1.0, %v281_v26 }
  0xba   :  { %v149_v27 = vsel %vm148_vm7, %v333_v5, %v145_v23  ;;  %v160_v34 = vmul.f32 %v158_v30, %v74_v31 }
  0xbb   :  { %v154_v28 = vsel %vm151_vm8, %v153_v24, %v149_v27 }
  0xbc   :  { %v155_v29 = vmul.f32 %v154_v28, %v130_v25 }
  0xbe   :  { %v282_v9 = vclamps-f32 %v155_v29, 1.0 }
  0xc0   :  { %v159_v33 = vadd.f32 1.0, %v282_v9 }
  0xc2   :  { %v161_v35 = vmul.f32 %v159_v33, %v75_v32 }
  0xc4   :  { %v164_v36 = vpack.c.bf16 %v161_v35, %v160_v34 }
  0xc6   :  { %237 = vmatmul.bf16.vlgmr.msra.gmra.mxu1 %v164_v36 }
 0x143   :  { %v238_v38 = vpop.f32.mrf.mxu1 }
 0x144   :  { %v243_v39 = vadd.f32 %v238_v38, %v162_v37 }
 0x146   :  { %245 = vst.msk [vmem:[#allocation2] sm:$0xff] %vm30_vm0, %v243_v39 }
 0x14b   :  { %v240_v40 = vpop.f32.mrf.mxu1 }
 0x14c   :  { %v244_v41 = vadd.f32 %v240_v40, %v163_v20 }
 0x14d   :  { %v250_v42 = vld [vmem:[#allocation2] sm:$0xff] }
 0x14e   :  { %246 = vst.msk [vmem:[#allocation2 + $0x8] sm:$0xff] %vm30_vm0, %v244_v41 }
 0x14f   :  { %252 = vst.msk [vmem:[#allocation3] sm:$0xff] %vm30_vm0, %v250_v42 }
 0x155   :  { %v251_v8 = vld [vmem:[#allocation2 + $0x8] sm:$0xff] }
 0x156   :  { %253 = vst.msk [vmem:[#allocation3 + $0x8] sm:$0xff] %vm30_vm0, %v251_v8 }
 0x157   :  { %266 = dma.vmem_to_hbm [thread:$0]  %s259_s4, 256, %s261_s20, [#allocation4], %s361_s21, %s361_s21, %s362_s22  }
 0x158   :  { %358 = dma.done.wait [#allocation4], 256  }
 0x159   :  { %359 = vsyncadd [#allocation4], 4294967040 }
 0x15a   :  { %271 = vsyncpa [#allocation4], 1 }

</bundles_post_ra>
